<compile_context>
chip_gen: v7x
topology: tpu7x:2x2x1
jax: 0.10.0
libtpu: 0.0.40
codegen_flags: <defaults>
</compile_context>

<pallas_src>
import jax
import jax.numpy as jnp
from jax.experimental import pallas as pl
from jax.experimental.pallas import tpu as pltpu

LANE = 128
SUBLANE = 8


def _round_up(x, m):
    return (x + m - 1) // m * m


def rnn_kernel(ids_ref, table_ref, wih_ref, whh_ref, b_ref, wfc_ref, bfc_ref, out_ref):
    """Single-invocation RNN forward.

    ids_ref  : (T*Bp, 1)  int32 time-major, batch-padded token ids
    table_ref: (Vp, Ep)   zero-padded embedding table (VMEM resident)
    wih_ref  : (Ep, Hp)   W_ih^T, zero padded
    whh_ref  : (Hp, Hp)   W_hh^T, zero padded
    b_ref    : (1, Hp)    b_ih + b_hh, zero padded
    wfc_ref  : (Hp, Op)   W_fc^T, zero padded
    bfc_ref  : (1, Op)    b_fc, zero padded
    out_ref  : (Bp, Op)   sigmoid(fc(h_T)); padded rows/lanes sliced off in wrapper
    """
    TB = ids_ref.shape[0]
    Vp, _ = table_ref.shape
    Bp = out_ref.shape[0]
    T = TB // Bp

    # In-kernel embedding gather as a one-hot MXU matmul (vocab is tiny and the
    # padded table lives in VMEM) -- no HBM round trip of gathered activations.
    ids = ids_ref[...]                                                  # (TB, 1)
    onehot = (jax.lax.broadcasted_iota(jnp.int32, (TB, Vp), 1) == ids
              ).astype(jnp.float32)                                     # (TB, Vp)
    x = jnp.dot(onehot, table_ref[...],
                preferred_element_type=jnp.float32)                     # (TB, Ep)

    # Input projection + bias hoisted out of the serial loop: one big matmul
    # (M = T*Bp) that the MXU pipelines fully; rides off the critical path.
    xw = (jnp.dot(x, wih_ref[...], preferred_element_type=jnp.float32)
          + b_ref[...])                                                 # (TB, Hp)

    # Serial recurrence: per-step work is just dot(h, W_hh^T) + tanh.
    # Padded hidden lanes stay exactly 0 (zero-padded columns/bias, tanh(0)=0).
    # T is a trace-time constant -> static unroll is fine at this size.
    # TODO(synk): for large T use lax.fori_loop(..., unroll=2..4) over a
    # (T, Bp, Hp) VMEM scratch of xw to bound vreg live ranges / compile time.
    h = jnp.zeros((Bp, xw.shape[1]), jnp.float32)
    for t in range(T):
        pre = jnp.dot(h, whh_ref[...], preferred_element_type=jnp.float32)
        h = jnp.tanh(pre + xw[t * Bp:(t + 1) * Bp, :])

    logits = (jnp.dot(h, wfc_ref[...], preferred_element_type=jnp.float32)
              + bfc_ref[...])
    out_ref[...] = jax.nn.sigmoid(logits)


def rnn_forward(token_ids, embed_table, w_ih, w_hh, b_ih, b_hh, w_fc, b_fc):
    """token_ids: (B, T) int32.  Returns (B, output_size) float32."""
    B, T = token_ids.shape
    if T < 1:
        raise ValueError("sequence length must be >= 1")
    V, E = embed_table.shape
    H = w_ih.shape[0]
    O = w_fc.shape[0]
    Bp = _round_up(B, SUBLANE)
    Vp = _round_up(V, LANE)
    Ep = _round_up(E, LANE)
    Hp = _round_up(H, LANE)
    Op = _round_up(O, LANE)
    f32 = jnp.float32

    # Time-major, batch-padded token ids.  Pad id 0 is a valid row; the padded
    # batch rows are computed independently and sliced off at the end.
    ids = jnp.pad(token_ids.astype(jnp.int32), ((0, Bp - B), (0, 0)))   # (Bp, T)
    ids_tm = ids.T.reshape(T * Bp, 1)                                   # (T*Bp, 1)

    # Zero-padded, lane-dense parameters.  Padded *columns* of W_ih/W_hh and the
    # bias keep padded hidden lanes at tanh(0)=0; padded *rows* multiply zeros.
    table_p = jnp.pad(embed_table.astype(f32), ((0, Vp - V), (0, Ep - E)))
    wih_t = jnp.pad(w_ih.T.astype(f32), ((0, Ep - E), (0, Hp - H)))     # (Ep, Hp)
    whh_t = jnp.pad(w_hh.T.astype(f32), ((0, Hp - H), (0, Hp - H)))     # (Hp, Hp)
    b = jnp.pad((b_ih + b_hh).astype(f32).reshape(1, H), ((0, 0), (0, Hp - H)))
    wfc_t = jnp.pad(w_fc.T.astype(f32), ((0, Hp - H), (0, Op - O)))     # (Hp, Op)
    bfc = jnp.pad(b_fc.astype(f32).reshape(1, O), ((0, 0), (0, Op - O)))

    out_p = pl.pallas_call(
        rnn_kernel,
        out_shape=jax.ShapeDtypeStruct((Bp, Op), f32),
        in_specs=[pl.BlockSpec(memory_space=pltpu.MemorySpace.VMEM)
                  for _ in range(7)],
        out_specs=pl.BlockSpec(memory_space=pltpu.MemorySpace.VMEM),
    )(ids_tm, table_p, wih_t, whh_t, b, wfc_t, bfc)

    return out_p[:B, :O]


def rnn_reference(token_ids, embed_table, w_ih, w_hh, b_ih, b_hh, w_fc, b_fc):
    """Pure-JAX reference matching torch nn.RNN(tanh, batch_first) + fc + sigmoid."""
    embeds = jnp.take(embed_table, token_ids, axis=0)  # (B, T, E)
    B, T, _ = embeds.shape
    H = w_ih.shape[0]
    h = jnp.zeros((B, H), jnp.float32)
    for t in range(T):
        h = jnp.tanh(embeds[:, t, :] @ w_ih.T + b_ih + h @ w_hh.T + b_hh)
    return jax.nn.sigmoid(h @ w_fc.T + b_fc)


if __name__ == "__main__":
    # Module hyperparameters (matching RNN.py)
    embedding_dim = 64
    hidden_size = 100
    n_layers = 1          # forward returns `output` (not output[-1]) when n_layers == 1
    output_size = 1
    vocab_size = 20       # len(vocab); embedding table has vocab_size + 1 rows

    # Small example shapes
    B, T = 4, 8

    key = jax.random.PRNGKey(0)
    ks = jax.random.split(key, 8)

    embed_table = jax.random.normal(ks[0], (vocab_size + 1, embedding_dim),
                                    jnp.float32) * 0.1
    w_ih = jax.random.normal(ks[1], (hidden_size, embedding_dim), jnp.float32) * 0.1
    w_hh = jax.random.normal(ks[2], (hidden_size, hidden_size), jnp.float32) * 0.1
    b_ih = jax.random.normal(ks[3], (hidden_size,), jnp.float32) * 0.1
    b_hh = jax.random.normal(ks[4], (hidden_size,), jnp.float32) * 0.1
    w_fc = jax.random.normal(ks[5], (output_size, hidden_size), jnp.float32) * 0.1
    b_fc = jax.random.normal(ks[6], (output_size,), jnp.float32) * 0.1

    token_ids = jax.random.randint(ks[7], (B, T), 0, vocab_size + 1, jnp.int32)

    fwd = jax.jit(rnn_forward)
    out = fwd(token_ids, embed_table, w_ih, w_hh, b_ih, b_hh, w_fc, b_fc)
    out = jax.block_until_ready(out)

    ref = rnn_reference(token_ids, embed_table, w_ih, w_hh, b_ih, b_hh, w_fc, b_fc)
    assert out.shape == (B, output_size), out.shape
    assert jnp.allclose(out, ref, atol=3e-5, rtol=3e-5), (out, ref)

    print("KERNEL_OK")
</pallas_src>

<mosaic_0001>
module attributes {stable_mosaic.version = 11 : i64} {
  func.func @rnn_kernel(%arg0: memref<64x1xi32, #tpu.memory_space<vmem>>, %arg1: memref<128x128xf32, #tpu.memory_space<vmem>>, %arg2: memref<128x128xf32, #tpu.memory_space<vmem>>, %arg3: memref<128x128xf32, #tpu.memory_space<vmem>>, %arg4: memref<1x128xf32, #tpu.memory_space<vmem>>, %arg5: memref<128x128xf32, #tpu.memory_space<vmem>>, %arg6: memref<1x128xf32, #tpu.memory_space<vmem>>, %arg7: memref<8x128xf32, #tpu.memory_space<vmem>>) attributes {dimension_semantics = [], scalar_prefetch = 0 : i64, scratch_operands = 0 : i64, tpu.core_type = #tpu.core_type<tc>} {
    %c0 = arith.constant 0 : index
    %c0_0 = arith.constant 0 : index
    %0 = vector.load %arg0[%c0, %c0_0] : memref<64x1xi32, #tpu.memory_space<vmem>>, vector<64x1xi32>
    %1 = tpu.iota {dimensions = array<i32: 1>} : vector<64x128xi32>
    %2 = vector.broadcast %0 : vector<64x1xi32> to vector<64x128xi32>
    %3 = arith.cmpi eq, %1, %2 : vector<64x128xi32>
    %4 = arith.extui %3 : vector<64x128xi1> to vector<64x128xi32>
    %5 = arith.sitofp %4 : vector<64x128xi32> to vector<64x128xf32>
    %c0_1 = arith.constant 0 : index
    %c0_2 = arith.constant 0 : index
    %6 = vector.load %arg1[%c0_1, %c0_2] : memref<128x128xf32, #tpu.memory_space<vmem>>, vector<128x128xf32>
    %cst = arith.constant dense<0.000000e+00> : vector<64x128xf32>
    %7 = tpu.matmul %5, %6, %cst {dimension_numbers = #tpu.dot_dimension_numbers<[1], [0], [0], [1], [0, 0, 1, 1], [], []>} : vector<64x128xf32>, vector<128x128xf32>, vector<64x128xf32> -> vector<64x128xf32>
    %c0_3 = arith.constant 0 : index
    %c0_4 = arith.constant 0 : index
    %8 = vector.load %arg2[%c0_3, %c0_4] : memref<128x128xf32, #tpu.memory_space<vmem>>, vector<128x128xf32>
    %cst_5 = arith.constant dense<0.000000e+00> : vector<64x128xf32>
    %9 = tpu.matmul %7, %8, %cst_5 {dimension_numbers = #tpu.dot_dimension_numbers<[1], [0], [0], [1], [0, 0, 1, 1], [], []>} : vector<64x128xf32>, vector<128x128xf32>, vector<64x128xf32> -> vector<64x128xf32>
    %c0_6 = arith.constant 0 : index
    %c0_7 = arith.constant 0 : index
    %10 = vector.load %arg4[%c0_6, %c0_7] : memref<1x128xf32, #tpu.memory_space<vmem>>, vector<1x128xf32>
    %11 = vector.broadcast %10 : vector<1x128xf32> to vector<64x128xf32>
    %12 = arith.addf %9, %11 : vector<64x128xf32>
    %cst_8 = arith.constant 0.000000e+00 : f32
    %13 = vector.broadcast %cst_8 : f32 to vector<8x128xf32>
    %c0_9 = arith.constant 0 : index
    %c0_10 = arith.constant 0 : index
    %14 = vector.load %arg3[%c0_9, %c0_10] : memref<128x128xf32, #tpu.memory_space<vmem>>, vector<128x128xf32>
    %cst_11 = arith.constant dense<0.000000e+00> : vector<8x128xf32>
    %15 = tpu.matmul %13, %14, %cst_11 {dimension_numbers = #tpu.dot_dimension_numbers<[1], [0], [0], [1], [0, 0, 1, 1], [], []>} : vector<8x128xf32>, vector<128x128xf32>, vector<8x128xf32> -> vector<8x128xf32>
    %16 = vector.extract_strided_slice %12 {offsets = [0, 0], sizes = [8, 128], strides = [1, 1]} : vector<64x128xf32> to vector<8x128xf32>
    %17 = arith.addf %15, %16 : vector<8x128xf32>
    %18 = math.tanh %17 : vector<8x128xf32>
    %c0_12 = arith.constant 0 : index
    %c0_13 = arith.constant 0 : index
    %19 = vector.load %arg3[%c0_12, %c0_13] : memref<128x128xf32, #tpu.memory_space<vmem>>, vector<128x128xf32>
    %cst_14 = arith.constant dense<0.000000e+00> : vector<8x128xf32>
    %20 = tpu.matmul %18, %19, %cst_14 {dimension_numbers = #tpu.dot_dimension_numbers<[1], [0], [0], [1], [0, 0, 1, 1], [], []>} : vector<8x128xf32>, vector<128x128xf32>, vector<8x128xf32> -> vector<8x128xf32>
    %21 = vector.extract_strided_slice %12 {offsets = [8, 0], sizes = [8, 128], strides = [1, 1]} : vector<64x128xf32> to vector<8x128xf32>
    %22 = arith.addf %20, %21 : vector<8x128xf32>
    %23 = math.tanh %22 : vector<8x128xf32>
    %c0_15 = arith.constant 0 : index
    %c0_16 = arith.constant 0 : index
    %24 = vector.load %arg3[%c0_15, %c0_16] : memref<128x128xf32, #tpu.memory_space<vmem>>, vector<128x128xf32>
    %cst_17 = arith.constant dense<0.000000e+00> : vector<8x128xf32>
    %25 = tpu.matmul %23, %24, %cst_17 {dimension_numbers = #tpu.dot_dimension_numbers<[1], [0], [0], [1], [0, 0, 1, 1], [], []>} : vector<8x128xf32>, vector<128x128xf32>, vector<8x128xf32> -> vector<8x128xf32>
    %26 = vector.extract_strided_slice %12 {offsets = [16, 0], sizes = [8, 128], strides = [1, 1]} : vector<64x128xf32> to vector<8x128xf32>
    %27 = arith.addf %25, %26 : vector<8x128xf32>
    %28 = math.tanh %27 : vector<8x128xf32>
    %c0_18 = arith.constant 0 : index
    %c0_19 = arith.constant 0 : index
    %29 = vector.load %arg3[%c0_18, %c0_19] : memref<128x128xf32, #tpu.memory_space<vmem>>, vector<128x128xf32>
    %cst_20 = arith.constant dense<0.000000e+00> : vector<8x128xf32>
    %30 = tpu.matmul %28, %29, %cst_20 {dimension_numbers = #tpu.dot_dimension_numbers<[1], [0], [0], [1], [0, 0, 1, 1], [], []>} : vector<8x128xf32>, vector<128x128xf32>, vector<8x128xf32> -> vector<8x128xf32>
    %31 = vector.extract_strided_slice %12 {offsets = [24, 0], sizes = [8, 128], strides = [1, 1]} : vector<64x128xf32> to vector<8x128xf32>
    %32 = arith.addf %30, %31 : vector<8x128xf32>
    %33 = math.tanh %32 : vector<8x128xf32>
    %c0_21 = arith.constant 0 : index
    %c0_22 = arith.constant 0 : index
    %34 = vector.load %arg3[%c0_21, %c0_22] : memref<128x128xf32, #tpu.memory_space<vmem>>, vector<128x128xf32>
    %cst_23 = arith.constant dense<0.000000e+00> : vector<8x128xf32>
    %35 = tpu.matmul %33, %34, %cst_23 {dimension_numbers = #tpu.dot_dimension_numbers<[1], [0], [0], [1], [0, 0, 1, 1], [], []>} : vector<8x128xf32>, vector<128x128xf32>, vector<8x128xf32> -> vector<8x128xf32>
    %36 = vector.extract_strided_slice %12 {offsets = [32, 0], sizes = [8, 128], strides = [1, 1]} : vector<64x128xf32> to vector<8x128xf32>
    %37 = arith.addf %35, %36 : vector<8x128xf32>
    %38 = math.tanh %37 : vector<8x128xf32>
    %c0_24 = arith.constant 0 : index
    %c0_25 = arith.constant 0 : index
    %39 = vector.load %arg3[%c0_24, %c0_25] : memref<128x128xf32, #tpu.memory_space<vmem>>, vector<128x128xf32>
    %cst_26 = arith.constant dense<0.000000e+00> : vector<8x128xf32>
    %40 = tpu.matmul %38, %39, %cst_26 {dimension_numbers = #tpu.dot_dimension_numbers<[1], [0], [0], [1], [0, 0, 1, 1], [], []>} : vector<8x128xf32>, vector<128x128xf32>, vector<8x128xf32> -> vector<8x128xf32>
    %41 = vector.extract_strided_slice %12 {offsets = [40, 0], sizes = [8, 128], strides = [1, 1]} : vector<64x128xf32> to vector<8x128xf32>
    %42 = arith.addf %40, %41 : vector<8x128xf32>
    %43 = math.tanh %42 : vector<8x128xf32>
    %c0_27 = arith.constant 0 : index
    %c0_28 = arith.constant 0 : index
    %44 = vector.load %arg3[%c0_27, %c0_28] : memref<128x128xf32, #tpu.memory_space<vmem>>, vector<128x128xf32>
    %cst_29 = arith.constant dense<0.000000e+00> : vector<8x128xf32>
    %45 = tpu.matmul %43, %44, %cst_29 {dimension_numbers = #tpu.dot_dimension_numbers<[1], [0], [0], [1], [0, 0, 1, 1], [], []>} : vector<8x128xf32>, vector<128x128xf32>, vector<8x128xf32> -> vector<8x128xf32>
    %46 = vector.extract_strided_slice %12 {offsets = [48, 0], sizes = [8, 128], strides = [1, 1]} : vector<64x128xf32> to vector<8x128xf32>
    %47 = arith.addf %45, %46 : vector<8x128xf32>
    %48 = math.tanh %47 : vector<8x128xf32>
    %c0_30 = arith.constant 0 : index
    %c0_31 = arith.constant 0 : index
    %49 = vector.load %arg3[%c0_30, %c0_31] : memref<128x128xf32, #tpu.memory_space<vmem>>, vector<128x128xf32>
    %cst_32 = arith.constant dense<0.000000e+00> : vector<8x128xf32>
    %50 = tpu.matmul %48, %49, %cst_32 {dimension_numbers = #tpu.dot_dimension_numbers<[1], [0], [0], [1], [0, 0, 1, 1], [], []>} : vector<8x128xf32>, vector<128x128xf32>, vector<8x128xf32> -> vector<8x128xf32>
    %51 = vector.extract_strided_slice %12 {offsets = [56, 0], sizes = [8, 128], strides = [1, 1]} : vector<64x128xf32> to vector<8x128xf32>
    %52 = arith.addf %50, %51 : vector<8x128xf32>
    %53 = math.tanh %52 : vector<8x128xf32>
    %c0_33 = arith.constant 0 : index
    %c0_34 = arith.constant 0 : index
    %54 = vector.load %arg5[%c0_33, %c0_34] : memref<128x128xf32, #tpu.memory_space<vmem>>, vector<128x128xf32>
    %cst_35 = arith.constant dense<0.000000e+00> : vector<8x128xf32>
    %55 = tpu.matmul %53, %54, %cst_35 {dimension_numbers = #tpu.dot_dimension_numbers<[1], [0], [0], [1], [0, 0, 1, 1], [], []>} : vector<8x128xf32>, vector<128x128xf32>, vector<8x128xf32> -> vector<8x128xf32>
    %c0_36 = arith.constant 0 : index
    %c0_37 = arith.constant 0 : index
    %56 = vector.load %arg6[%c0_36, %c0_37] : memref<1x128xf32, #tpu.memory_space<vmem>>, vector<1x128xf32>
    %57 = vector.broadcast %56 : vector<1x128xf32> to vector<8x128xf32>
    %58 = arith.addf %55, %57 : vector<8x128xf32>
    %59 = arith.negf %58 : vector<8x128xf32>
    %60 = math.exp %59 : vector<8x128xf32>
    %cst_38 = arith.constant 1.000000e+00 : f32
    %61 = vector.broadcast %cst_38 : f32 to vector<8x128xf32>
    %62 = arith.addf %61, %60 : vector<8x128xf32>
    %63 = arith.divf %61, %62 : vector<8x128xf32>
    %c0_39 = arith.constant 0 : index
    %c0_40 = arith.constant 0 : index
    %64 = vector.load %arg7[%c0_39, %c0_40] : memref<8x128xf32, #tpu.memory_space<vmem>>, vector<8x128xf32>
    tpu.vector_store %arg7[%c0_39, %c0_40], %63 {strides = array<i32>} : memref<8x128xf32, #tpu.memory_space<vmem>>, vector<8x128xf32>,
    return
  }
}

</mosaic_0001>

<bundles_post_ra>
// kernel: rnn_forward.1
= control target key start
LH: loop header
LB: loop body
LE: loop exit
PB: predicated region body
PF: predicated region fallthrough
CT: control target
= control target key end

     0   :  { %v1951_v0 = vmov 0   ;;  %v1952_v53 = vmov 0.0|0.0   ;;  %v34_v58 = vlaneseq  ;;  %vm1954_vm8 = vmmov 0   ;;  %s2407_s0 = inlined_call_operand.vmem [shape: s32[64,1], index: 0, kind: input, shape index: {}]   ;;  %s2408_s1 = inlined_call_operand.vmem [shape: f32[128,128], index: 1, kind: input, shape index: {}]   ;;  %s2409_s2 = inlined_call_operand.vmem [shape: f32[128,128], index: 2, kind: input, shape index: {}]   ;;  %s2410_s3 = inlined_call_operand.vmem [shape: f32[128,128], index: 3, kind: input, shape index: {}]   ;;  %s2411_s4 = inlined_call_operand.vmem [shape: f32[1,128], index: 4, kind: input, shape index: {}]   ;;  %s2412_s5 = inlined_call_operand.vmem [shape: f32[128,128], index: 5, kind: input, shape index: {}]   ;;  %s2413_s6 = inlined_call_operand.vmem [shape: f32[1,128], index: 6, kind: input, shape index: {}]   ;;  %s2414_s7 = inlined_call_operand.vmem [shape: f32[8,128], index: 7, kind: output, shape index: {}]  }
   0x1   :  { %1929 = vset.pattern.permute.xlu0 %v1951_v0  ;;  %v26_v1 = vld [vmem:[%s2407_s0] sm:$0xff]  ;;  %1930 = vset.pattern.permute.xlu1 %v1951_v0  ;;  %v28_v2 = vld [vmem:[%s2407_s0 + $0x10] sm:$0xff]  ;;  %v27_v3 = vld [vmem:[%s2407_s0 + $0x8] sm:$0xff]  ;;  %v1953_v0 = vmov 1.0  }
   0x2   :  { %37 = vperm.xlu0 %1929, %v26_v1   ;;  %43 = vperm.xlu1 %1930, %v28_v2   ;;  %v29_v4 = vld [vmem:[%s2407_s0 + $0x18] sm:$0xff]  ;;  %v84_v5 = vld [vmem:[%s2408_s1] sm:$0xff]  ;;  %v85_v6 = vld [vmem:[%s2408_s1 + $0x8] sm:$0xff]  ;;  %v35_v59 = vand.u32 127, %v34_v58 }
   0x3   :  { %v1644_v7 = vpack.c.bf16 %v85_v6, %v84_v5  ;;  %v86_v8 = vld [vmem:[%s2408_s1 + $0x10] sm:$0xff]  ;;  %v87_v9 = vld [vmem:[%s2408_s1 + $0x18] sm:$0xff]  ;;  %v88_v11 = vld [vmem:[%s2408_s1 + $0x20] sm:$0xff] }
   0x4   :  { %v1648_v10 = vpack.c.bf16 %v87_v9, %v86_v8  ;;  %v89_v12 = vld [vmem:[%s2408_s1 + $0x28] sm:$0xff]  ;;  %v30_v13 = vld [vmem:[%s2407_s0 + $0x20] sm:$0xff]  ;;  %v90_v16 = vld [vmem:[%s2408_s1 + $0x30] sm:$0xff] }
   0x5   :  { %v31_v14 = vld [vmem:[%s2407_s0 + $0x28] sm:$0xff]  ;;  %1645 = vmatprep.subr.bf16.mxu0 %v1644_v7  ;;  %v1652_v15 = vpack.c.bf16 %v89_v12, %v88_v11  ;;  %v91_v17 = vld [vmem:[%s2408_s1 + $0x38] sm:$0xff]  ;;  %v32_v18 = vld [vmem:[%s2407_s0 + $0x30] sm:$0xff] }
   0x6   :  { %40 = vperm.xlu0 %1929, %v27_v3   ;;  %46 = vperm.xlu1 %1930, %v29_v4   ;;  %v1656_v19 = vpack.c.bf16 %v91_v17, %v90_v16  ;;  %v92_v20 = vld [vmem:[%s2408_s1 + $0x40] sm:$0xff]  ;;  %v93_v21 = vld [vmem:[%s2408_s1 + $0x48] sm:$0xff]  ;;  %v33_v22 = vld [vmem:[%s2407_s0 + $0x38] sm:$0xff] }
   0x7   :  { %1647 = vmatpush3.bf16.msra.mxu0 %v1644_v7  ;;  %v1660_v23 = vpack.c.bf16 %v93_v21, %v92_v20  ;;  %v94_v24 = vld [vmem:[%s2408_s1 + $0x50] sm:$0xff]  ;;  %v205_v25 = vld [vmem:[%s2409_s2] sm:$0xff]  ;;  %v206_v26 = vld [vmem:[%s2409_s2 + $0x8] sm:$0xff] }
   0x8   :  { %1649 = vmatprep.subr.bf16.mxu0 %v1648_v10  ;;  %v95_v27 = vld [vmem:[%s2408_s1 + $0x58] sm:$0xff]  ;;  %v1676_v28 = vpack.c.bf16 %v206_v26, %v205_v25  ;;  %v207_v29 = vld [vmem:[%s2409_s2 + $0x10] sm:$0xff]  ;;  %v209_v32 = vld [vmem:[%s2409_s2 + $0x20] sm:$0xff] }
   0x9   :  { %v208_v30 = vld [vmem:[%s2409_s2 + $0x18] sm:$0xff]  ;;  %v210_v33 = vld [vmem:[%s2409_s2 + $0x28] sm:$0xff]  ;;  %v1664_v34 = vpack.c.bf16 %v95_v27, %v94_v24  ;;  %v96_v35 = vld [vmem:[%s2408_s1 + $0x60] sm:$0xff] }
   0xa   :  { %49 = vperm.xlu0 %1929, %v30_v13   ;;  %52 = vperm.xlu1 %1930, %v31_v14   ;;  %v1680_v31 = vpack.c.bf16 %v208_v30, %v207_v29  ;;  %v97_v36 = vld [vmem:[%s2408_s1 + $0x68] sm:$0xff]  ;;  %v1684_v37 = vpack.c.bf16 %v210_v33, %v209_v32  ;;  %v211_v38 = vld [vmem:[%s2409_s2 + $0x30] sm:$0xff]  ;;  %v212_v39 = vld [vmem:[%s2409_s2 + $0x38] sm:$0xff]  ;;  %v1955_v29 = vmov 0.0  }
   0xb   :  { %1651 = vmatpush3.bf16.msra.mxu0 %v1648_v10  ;;  %1677 = vmatprep.subr.bf16.mxu1 %v1676_v28  ;;  %v1668_v40 = vpack.c.bf16 %v97_v36, %v96_v35  ;;  %v98_v41 = vld [vmem:[%s2408_s1 + $0x70] sm:$0xff]  ;;  %v99_v42 = vld [vmem:[%s2408_s1 + $0x78] sm:$0xff]  ;;  %v1688_v43 = vpack.c.bf16 %v212_v39, %v211_v38  ;;  %v213_v44 = vld [vmem:[%s2409_s2 + $0x40] sm:$0xff] }
   0xc   :  { %1653 = vmatprep.subr.bf16.mxu0 %v1652_v15  ;;  %1679 = vmatpush3.bf16.msra.mxu1 %v1676_v28  ;;  %v214_v45 = vld [vmem:[%s2409_s2 + $0x48] sm:$0xff]  ;;  %v1672_v46 = vpack.c.bf16 %v99_v42, %v98_v41  ;;  %v215_v48 = vld [vmem:[%s2409_s2 + $0x50] sm:$0xff]  ;;  %v216_v49 = vld [vmem:[%s2409_s2 + $0x58] sm:$0xff] }
   0xd   :  { %1681 = vmatprep.subr.bf16.mxu1 %v1680_v31  ;;  %v1692_v47 = vpack.c.bf16 %v214_v45, %v213_v44  ;;  %v1696_v50 = vpack.c.bf16 %v216_v49, %v215_v48  ;;  %v217_v51 = vld [vmem:[%s2409_s2 + $0x60] sm:$0xff]  ;;  %v218_v52 = vld [vmem:[%s2409_s2 + $0x68] sm:$0xff]  ;;  %v219_v55 = vld [vmem:[%s2409_s2 + $0x70] sm:$0xff] }
   0xe   :  { %55 = vperm.xlu0 %1929, %v32_v18   ;;  %58 = vperm.xlu1 %1930, %v33_v22   ;;  %v1700_v54 = vpack.c.bf16 %v218_v52, %v217_v51  ;;  %v220_v56 = vld [vmem:[%s2409_s2 + $0x78] sm:$0xff]  ;;  %v333_v62 = vld [vmem:[%s2410_s3] sm:$0xff]  ;;  %v334_v63 = vld [vmem:[%s2410_s3 + $0x8] sm:$0xff] }
   0xf   :  { %1655 = vmatpush3.bf16.msra.mxu0 %v1652_v15  ;;  %v1704_v57 = vpack.c.bf16 %v220_v56, %v219_v55  ;;  %v2124_v1 = vpack.c.bf16 %v334_v63, %v333_v62  ;;  %v335_v4 = vld [vmem:[%s2410_s3 + $0x10] sm:$0xff]  ;;  %v336_v5 = vld [vmem:[%s2410_s3 + $0x18] sm:$0xff]  ;;  %v337_v9 = vld [vmem:[%s2410_s3 + $0x20] sm:$0xff] }
  0x10   :  { %1657 = vmatprep.subr.bf16.mxu0 %v1656_v19  ;;  %1683 = vmatpush3.bf16.msra.mxu1 %v1680_v31  ;;  %v2133_v6 = vpack.c.bf16 %v336_v5, %v335_v4  ;;  %v338_v10 = vld [vmem:[%s2410_s3 + $0x28] sm:$0xff]  ;;  %v339_v13 = vld [vmem:[%s2410_s3 + $0x30] sm:$0xff]  ;;  %v340_v14 = vld [vmem:[%s2410_s3 + $0x38] sm:$0xff] }
  0x11   :  { %1685 = vmatprep.subr.bf16.mxu1 %v1684_v37  ;;  %v2143_v11 = vpack.c.bf16 %v338_v10, %v337_v9  ;;  %v2153_v16 = vpack.c.bf16 %v340_v14, %v339_v13  ;;  %v341_v17 = vld [vmem:[%s2410_s3 + $0x40] sm:$0xff]  ;;  %v342_v18 = vld [vmem:[%s2410_s3 + $0x48] sm:$0xff]  ;;  %v343_v20 = vld [vmem:[%s2410_s3 + $0x50] sm:$0xff] }
  0x12   :  { %v344_v21 = vld [vmem:[%s2410_s3 + $0x58] sm:$0xff]  ;;  %v346_v24 = vld [vmem:[%s2410_s3 + $0x68] sm:$0xff]  ;;  %v347_v26 = vld [vmem:[%s2410_s3 + $0x70] sm:$0xff] }
  0x13   :  { %1659 = vmatpush3.bf16.msra.mxu0 %v1656_v19  ;;  %v2163_v19 = vpack.c.bf16 %v342_v18, %v341_v17  ;;  %v2173_v22 = vpack.c.bf16 %v344_v21, %v343_v20  ;;  %v348_v27 = vld [vmem:[%s2410_s3 + $0x78] sm:$0xff]  ;;  %v918_v17 = vld [vmem:[%s2412_s5 + $0x8] sm:$0xff]  ;;  %v919_v18 = vld [vmem:[%s2412_s5 + $0x10] sm:$0xff] }
  0x14   :  { %1661 = vmatprep.subr.bf16.mxu0 %v1660_v23  ;;  %1687 = vmatpush3.bf16.msra.mxu1 %v1684_v37  ;;  %v2194_v28 = vpack.c.bf16 %v348_v27, %v347_v26  ;;  %v920_v20 = vld [vmem:[%s2412_s5 + $0x18] sm:$0xff] }
  0x15   :  { %1689 = vmatprep.subr.bf16.mxu1 %v1688_v43  ;;  %v1904_v21 = vpack.c.bf16 %v920_v20, %v919_v18  ;;  %v924_v26 = vld [vmem:[%s2412_s5 + $0x38] sm:$0xff] }
  0x17   :  { %1663 = vmatpush3.bf16.msra.mxu0 %v1660_v23  ;;  %v345_v23 = vld [vmem:[%s2410_s3 + $0x60] sm:$0xff] }
  0x18   :  { %1665 = vmatprep.subr.bf16.mxu0 %v1664_v34  ;;  %1691 = vmatpush3.bf16.msra.mxu1 %v1688_v43  ;;  %v2183_v25 = vpack.c.bf16 %v346_v24, %v345_v23  ;;  %v922_v23 = vld [vmem:[%s2412_s5 + $0x28] sm:$0xff] }
  0x19   :  { %1693 = vmatprep.subr.bf16.mxu1 %v1692_v47 }
  0x1b   :  { %1667 = vmatpush3.bf16.msra.mxu0 %v1664_v34 }
  0x1c   :  { %1669 = vmatprep.subr.bf16.mxu0 %v1668_v40  ;;  %1695 = vmatpush3.bf16.msra.mxu1 %v1692_v47 }
  0x1d   :  { %1697 = vmatprep.subr.bf16.mxu1 %v1696_v50 }
  0x1f   :  { %1671 = vmatpush3.bf16.msra.mxu0 %v1668_v40  ;;  %v1037_v40 = vld [vmem:[%s2411_s4] ss:$0 sm:$0xff] }
  0x20   :  { %1673 = vmatprep.subr.bf16.mxu0 %v1672_v46  ;;  %1699 = vmatpush3.bf16.msra.mxu1 %v1696_v50 }
  0x21   :  { %1701 = vmatprep.subr.bf16.mxu1 %v1700_v54 }
  0x23   :  { %1675 = vmatpush3.bf16.msra.mxu0 %v1672_v46 }
  0x24   :  { %1708 = vmatprep.subr.bf16.mxu0 %v1952_v53  ;;  %1703 = vmatpush3.bf16.msra.mxu1 %v1700_v54 }
  0x25   :  { %1705 = vmatprep.subr.bf16.mxu1 %v1704_v57 }
  0x28   :  { %1707 = vmatpush3.bf16.msra.mxu1 %v1704_v57 }
  0x29   :  { %1732 = vmatprep.subr.bf16.mxu1 %v1952_v53 }
  0x81   :  { %v38_v60 = vpop.permute.xlu0 %37  ;;  %v44_v61 = vpop.permute.xlu1 %43 }
  0x82   :  { %vm60_vm0 = vcmp.eq.s32.totalorder %v35_v59, %v38_v60  ;;  %vm62_vm1 = vcmp.eq.s32.totalorder %v35_v59, %v44_v61 }
  0x83   :  { %1273 = vmatprep.mubr.msk.f32.mxu0 %vm60_vm0, %v1953_v0 }
  0x85   :  { %v41_v2 = vpop.permute.xlu0 %40  ;;  %v47_v3 = vpop.permute.xlu1 %46 }
  0x86   :  { %vm61_vm2 = vcmp.eq.s32.totalorder %v35_v59, %v41_v2  ;;  %vm63_vm3 = vcmp.eq.s32.totalorder %v35_v59, %v47_v3 }
  0x87   :  { %1274 = vmatmul.mubr.msk.f32.vlgmr.msra.gmra.mrb[0].mxu0 %vm61_vm2, %v1953_v0 }
  0x88   :  { %1276 = vmatprep.mubr.msk.f32.mxu0 %vm62_vm1, %v1953_v0  ;;  %1710 = vmatpush3.bf16.msra.mxu0 %v2124_v1 }
  0x89   :  { %v50_v7 = vpop.permute.xlu0 %49  ;;  %v53_v8 = vpop.permute.xlu1 %52  ;;  %1711 = vmatprep.subr.bf16.mxu0 %v1952_v53 }
  0x8a   :  { %vm64_vm4 = vcmp.eq.s32.totalorder %v35_v59, %v50_v7  ;;  %vm65_vm5 = vcmp.eq.s32.totalorder %v35_v59, %v53_v8 }
  0x8b   :  { %1277 = vmatmul.mubr.msk.f32.gmra.mrb[2].mxu0 %vm63_vm3, %v1953_v0 }
  0x8c   :  { %1279 = vmatprep.mubr.msk.f32.mxu0 %vm64_vm4, %v1953_v0  ;;  %1713 = vmatpush3.bf16.msra.mxu0 %v2133_v6 }
  0x8d   :  { %v56_v12 = vpop.permute.xlu0 %55  ;;  %1714 = vmatprep.subr.bf16.mxu0 %v1952_v53  ;;  %v59_v15 = vpop.permute.xlu1 %58 }
  0x8e   :  { %vm66_vm6 = vcmp.eq.s32.totalorder %v35_v59, %v56_v12  ;;  %vm67_vm7 = vcmp.eq.s32.totalorder %v35_v59, %v59_v15 }
  0x8f   :  { %1280 = vmatmul.mubr.msk.f32.gmra.mrb[4].mxu0 %vm65_vm5, %v1953_v0 }
  0x90   :  { %1282 = vmatprep.mubr.msk.f32.mxu0 %vm66_vm6, %v1953_v0  ;;  %1716 = vmatpush3.bf16.msra.mxu0 %v2143_v11 }
  0x91   :  { %1717 = vmatprep.subr.bf16.mxu0 %v1952_v53 }
  0x93   :  { %1283 = vmatmul.mubr.msk.f32.gmra.mrb[6].mxu0 %vm67_vm7, %v1953_v0 }
  0x94   :  { %1719 = vmatpush3.bf16.msra.mxu0 %v2153_v16  ;;  %1361 = vmatprep.mubr.msk.f32.mxu0 %vm1954_vm8, %v1955_v29 }
  0x95   :  { %1720 = vmatprep.subr.bf16.mxu0 %v1952_v53 }
  0x98   :  { %1722 = vmatpush3.bf16.msra.mxu0 %v2163_v19 }
  0x99   :  { %1723 = vmatprep.subr.bf16.mxu0 %v1952_v53 }
  0x9c   :  { %1725 = vmatpush3.bf16.msra.mxu0 %v2173_v22 }
  0x9d   :  { %1726 = vmatprep.subr.bf16.mxu0 %v1952_v53 }
  0xa0   :  { %1728 = vmatpush3.bf16.msra.mxu0 %v2183_v25 }
  0xa1   :  { %1729 = vmatprep.subr.bf16.mxu0 %v1952_v53 }
  0xa4   :  { %1731 = vmatpush3.bf16.msra.mxu0 %v2194_v28 }
  0xa5   :  { %1756 = vmatprep.subr.bf16.mxu0 %v1952_v53 }
  0xa7   :  { %1362 = vmatmul.mubr.f32.vlgmr.msra.gmra.mrb[8].mxu0 %v1955_v29 }
  0xa8   :  { %1758 = vmatpush3.bf16.msra.mxu0 %v2124_v1  ;;  %1431 = vmatprep.mubr.msk.f32.mxu0 %vm1954_vm8, %v1955_v29 }
  0xa9   :  { %1759 = vmatprep.subr.bf16.mxu0 %v1952_v53 }
  0xac   :  { %1761 = vmatpush3.bf16.msra.mxu0 %v2133_v6 }
  0xad   :  { %1762 = vmatprep.subr.bf16.mxu0 %v1952_v53 }
  0xb0   :  { %1764 = vmatpush3.bf16.msra.mxu0 %v2143_v11 }
  0xb1   :  { %1765 = vmatprep.subr.bf16.mxu0 %v1952_v53 }
  0xb4   :  { %1767 = vmatpush3.bf16.msra.mxu0 %v2153_v16 }
  0xb5   :  { %1768 = vmatprep.subr.bf16.mxu0 %v1952_v53 }
  0xb8   :  { %1770 = vmatpush3.bf16.msra.mxu0 %v2163_v19 }
  0xb9   :  { %1771 = vmatprep.subr.bf16.mxu0 %v1952_v53 }
  0xbc   :  { %1773 = vmatpush3.bf16.msra.mxu0 %v2173_v22 }
  0xbd   :  { %1774 = vmatprep.subr.bf16.mxu0 %v1952_v53 }
  0xc0   :  { %1776 = vmatpush3.bf16.msra.mxu0 %v2183_v25 }
  0xc1   :  { %1777 = vmatprep.subr.bf16.mxu0 %v1952_v53 }
  0xc4   :  { %1779 = vmatpush3.bf16.msra.mxu0 %v2194_v28 }
  0xc5   :  { %1804 = vmatprep.subr.bf16.mxu0 %v1952_v53 }
 0x15a   :  { %v1275_v30 = vpop.f32.mrb[0].mxu0 }
 0x15b   :  { %v166_v31 = vpop.f32.mrb[1].mxu0 }
 0x15c   :  { %1317 = vmatprep.mubr.f32.mxu1 %v166_v31 }
 0x15d   :  { %1318 = vmatmul.mubr.f32.vlgmr.msra.gmra.mrb[0].mxu1 %v1275_v30 }
 0x15e   :  { %v1278_v32 = vpop.f32.mrb[2].mxu0  ;;  %1734 = vmatpush3.bf16.msra.mxu1 %v2124_v1 }
 0x15f   :  { %v176_v33 = vpop.f32.mrb[3].mxu0  ;;  %1735 = vmatprep.subr.bf16.mxu1 %v1952_v53 }
 0x160   :  { %1320 = vmatprep.mubr.f32.mxu1 %v176_v33 }
 0x161   :  { %1321 = vmatmul.mubr.f32.gmra.mrb[2].mxu1 %v1278_v32 }
 0x162   :  { %v1281_v34 = vpop.f32.mrb[4].mxu0  ;;  %1737 = vmatpush3.bf16.msra.mxu1 %v2133_v6 }
 0x163   :  { %v186_v35 = vpop.f32.mrb[5].mxu0  ;;  %1738 = vmatprep.subr.bf16.mxu1 %v1952_v53 }
 0x164   :  { %1323 = vmatprep.mubr.f32.mxu1 %v186_v35  ;;  %v927_v35 = vld [vmem:[%s2412_s5 + $0x50] sm:$0xff] }
 0x165   :  { %1324 = vmatmul.mubr.f32.gmra.mrb[4].mxu1 %v1281_v34 }
 0x166   :  { %v1284_v36 = vpop.f32.mrb[6].mxu0  ;;  %1740 = vmatpush3.bf16.msra.mxu1 %v2143_v11 }
 0x167   :  { %v196_v37 = vpop.f32.mrb[7].mxu0  ;;  %1741 = vmatprep.subr.bf16.mxu1 %v1952_v53 }
 0x168   :  { %1326 = vmatprep.mubr.f32.mxu1 %v196_v37 }
 0x169   :  { %1327 = vmatmul.mubr.f32.gmra.mrb[6].mxu1 %v1284_v36  ;;  %v928_v36 = vld [vmem:[%s2412_s5 + $0x58] sm:$0xff] }
 0x16a   :  { %1743 = vmatpush3.bf16.msra.mxu1 %v2153_v16  ;;  %1396 = vmatprep.mubr.msk.f32.mxu1 %vm1954_vm8, %v1955_v29  ;;  %v1916_v37 = vpack.c.bf16 %v928_v36, %v927_v35 }
 0x16b   :  { %1744 = vmatprep.subr.bf16.mxu1 %v1952_v53 }
 0x16e   :  { %1746 = vmatpush3.bf16.msra.mxu1 %v2163_v19 }
 0x16f   :  { %1747 = vmatprep.subr.bf16.mxu1 %v1952_v53 }
 0x172   :  { %1749 = vmatpush3.bf16.msra.mxu1 %v2173_v22 }
 0x173   :  { %1750 = vmatprep.subr.bf16.mxu1 %v1952_v53 }
 0x176   :  { %1752 = vmatpush3.bf16.msra.mxu1 %v2183_v25 }
 0x177   :  { %1753 = vmatprep.subr.bf16.mxu1 %v1952_v53 }
 0x17a   :  { %1755 = vmatpush3.bf16.msra.mxu1 %v2194_v28  ;;  %v415_v38 = vpop.f32.mrb[8].mxu0 }
 0x17b   :  { %1780 = vmatprep.subr.bf16.mxu1 %v1952_v53  ;;  %v1363_v39 = vpop.f32.mrb[9].mxu0 }
 0x17c   :  { %v930_v39 = vld [vmem:[%s2412_s5 + $0x68] sm:$0xff] }
 0x230   :  { %v1319_v41 = vpop.f32.mrb[0].mxu1 }
 0x231   :  { %v300_v42 = vadd.f32 %v1319_v41, %v1037_v40  ;;  %v294_v43 = vpop.f32.mrb[1].mxu1  ;;  %v931_v41 = vld [vmem:[%s2412_s5 + $0x70] sm:$0xff] }
 0x232   :  { %v295_v44 = vadd.f32 %v1037_v40, %v294_v43 }
 0x234   :  { %v416_v45 = vadd.f32 %v415_v38, %v295_v44  ;;  %v1322_v46 = vpop.f32.mrb[2].mxu1  ;;  %v929_v38 = vld [vmem:[%s2412_s5 + $0x60] sm:$0xff] }
 0x235   :  { %v2240_v47 = vadd.f32 %v1322_v46, %v1037_v40  ;;  %v304_v48 = vpop.f32.mrb[3].mxu1 }
 0x236   :  { %1931 = vtanh.f32 %v416_v45  ;;  %v305_v49 = vadd.f32 %v1037_v40, %v304_v48  ;;  %v1038_v48 = vld [vmem:[%s2413_s6] ss:$0 sm:$0xff] }
 0x238   :  { %v1325_v50 = vpop.f32.mrb[4].mxu1 }
 0x239   :  { %v2242_v51 = vadd.f32 %v1325_v50, %v1037_v40  ;;  %v314_v52 = vpop.f32.mrb[5].mxu1 }
 0x23a   :  { %v2244_v54 = vadd.f32 %v1037_v40, %v314_v52 }
 0x23c   :  { %v1328_v55 = vpop.f32.mrb[6].mxu1 }
 0x23d   :  { %v2246_v56 = vadd.f32 %v1328_v55, %v1037_v40  ;;  %v324_v57 = vpop.f32.mrb[7].mxu1 }
 0x23e   :  { %v2248_v58 = vadd.f32 %v1037_v40, %v324_v57  ;;  %v1919_v40 = vpack.c.bf16 %v930_v39, %v929_v38 }
 0x240   :  { %v1932_v59 = vpop.eup %1931 }
 0x241   :  { %1397 = vmatmul.mubr.f32.vlgmr.msra.gmra.mrb[8].mxu1 %v1932_v59 }
 0x242   :  { %1782 = vmatpush3.bf16.msra.mxu1 %v2124_v1  ;;  %1466 = vmatprep.mubr.msk.f32.mxu1 %vm1954_vm8, %v1955_v29 }
 0x243   :  { %1783 = vmatprep.subr.bf16.mxu1 %v1952_v53 }
 0x246   :  { %1785 = vmatpush3.bf16.msra.mxu1 %v2133_v6 }
 0x247   :  { %1786 = vmatprep.subr.bf16.mxu1 %v1952_v53 }
 0x24a   :  { %1788 = vmatpush3.bf16.msra.mxu1 %v2143_v11 }
 0x24b   :  { %1789 = vmatprep.subr.bf16.mxu1 %v1952_v53 }
 0x24e   :  { %1791 = vmatpush3.bf16.msra.mxu1 %v2153_v16 }
 0x24f   :  { %1792 = vmatprep.subr.bf16.mxu1 %v1952_v53 }
 0x252   :  { %1794 = vmatpush3.bf16.msra.mxu1 %v2163_v19 }
 0x253   :  { %1795 = vmatprep.subr.bf16.mxu1 %v1952_v53 }
 0x256   :  { %1797 = vmatpush3.bf16.msra.mxu1 %v2173_v22 }
 0x257   :  { %1798 = vmatprep.subr.bf16.mxu1 %v1952_v53 }
 0x25a   :  { %1800 = vmatpush3.bf16.msra.mxu1 %v2183_v25 }
 0x25b   :  { %1801 = vmatprep.subr.bf16.mxu1 %v1952_v53 }
 0x25e   :  { %1803 = vmatpush3.bf16.msra.mxu1 %v2194_v28 }
 0x25f   :  { %1828 = vmatprep.subr.bf16.mxu1 %v1952_v53 }
 0x314   :  { %v486_v60 = vpop.f32.mrb[8].mxu1 }
 0x315   :  { %v487_v61 = vadd.f32 %v486_v60, %v300_v42  ;;  %v1398_v62 = vpop.f32.mrb[9].mxu1  ;;  %v932_v42 = vld [vmem:[%s2412_s5 + $0x78] sm:$0xff] }
 0x316   :  { %v1922_v43 = vpack.c.bf16 %v932_v42, %v931_v41 }
 0x317   :  { %1933 = vtanh.f32 %v487_v61 }
 0x321   :  { %v1934_v63 = vpop.eup %1933 }
 0x322   :  { %1432 = vmatmul.mubr.f32.vlgmr.msra.gmra.mrb[10].mxu0 %v1934_v63 }
 0x323   :  { %1806 = vmatpush3.bf16.msra.mxu0 %v2124_v1  ;;  %1501 = vmatprep.mubr.msk.f32.mxu0 %vm1954_vm8, %v1955_v29 }
 0x324   :  { %1807 = vmatprep.subr.bf16.mxu0 %v1952_v53 }
 0x327   :  { %1809 = vmatpush3.bf16.msra.mxu0 %v2133_v6 }
 0x328   :  { %1810 = vmatprep.subr.bf16.mxu0 %v1952_v53 }
 0x32b   :  { %1812 = vmatpush3.bf16.msra.mxu0 %v2143_v11 }
 0x32c   :  { %1813 = vmatprep.subr.bf16.mxu0 %v1952_v53 }
 0x32f   :  { %1815 = vmatpush3.bf16.msra.mxu0 %v2153_v16 }
 0x330   :  { %1816 = vmatprep.subr.bf16.mxu0 %v1952_v53 }
 0x333   :  { %1818 = vmatpush3.bf16.msra.mxu0 %v2163_v19 }
 0x334   :  { %1819 = vmatprep.subr.bf16.mxu0 %v1952_v53 }
 0x337   :  { %1821 = vmatpush3.bf16.msra.mxu0 %v2173_v22 }
 0x338   :  { %1822 = vmatprep.subr.bf16.mxu0 %v1952_v53 }
 0x33b   :  { %1824 = vmatpush3.bf16.msra.mxu0 %v2183_v25 }
 0x33c   :  { %1825 = vmatprep.subr.bf16.mxu0 %v1952_v53 }
 0x33f   :  { %1827 = vmatpush3.bf16.msra.mxu0 %v2194_v28 }
 0x340   :  { %1852 = vmatprep.subr.bf16.mxu0 %v1952_v53 }
 0x3f5   :  { %v557_v0 = vpop.f32.mrb[10].mxu0 }
 0x3f6   :  { %v558_v2 = vadd.f32 %v557_v0, %v305_v49  ;;  %v1433_v3 = vpop.f32.mrb[11].mxu0 }
 0x3f8   :  { %1935 = vtanh.f32 %v558_v2 }
 0x402   :  { %v1936_v4 = vpop.eup %1935 }
 0x403   :  { %1467 = vmatmul.mubr.f32.vlgmr.msra.gmra.mrb[10].mxu1 %v1936_v4 }
 0x404   :  { %1830 = vmatpush3.bf16.msra.mxu1 %v2124_v1  ;;  %1536 = vmatprep.mubr.msk.f32.mxu1 %vm1954_vm8, %v1955_v29 }
 0x405   :  { %1831 = vmatprep.subr.bf16.mxu1 %v1952_v53 }
 0x408   :  { %1833 = vmatpush3.bf16.msra.mxu1 %v2133_v6 }
 0x409   :  { %1834 = vmatprep.subr.bf16.mxu1 %v1952_v53 }
 0x40c   :  { %1836 = vmatpush3.bf16.msra.mxu1 %v2143_v11 }
 0x40d   :  { %1837 = vmatprep.subr.bf16.mxu1 %v1952_v53 }
 0x410   :  { %1839 = vmatpush3.bf16.msra.mxu1 %v2153_v16 }
 0x411   :  { %1840 = vmatprep.subr.bf16.mxu1 %v1952_v53 }
 0x414   :  { %1842 = vmatpush3.bf16.msra.mxu1 %v2163_v19 }
 0x415   :  { %1843 = vmatprep.subr.bf16.mxu1 %v1952_v53 }
 0x418   :  { %1845 = vmatpush3.bf16.msra.mxu1 %v2173_v22 }
 0x419   :  { %1846 = vmatprep.subr.bf16.mxu1 %v1952_v53 }
 0x41c   :  { %1848 = vmatpush3.bf16.msra.mxu1 %v2183_v25 }
 0x41d   :  { %1849 = vmatprep.subr.bf16.mxu1 %v1952_v53 }
 0x420   :  { %1851 = vmatpush3.bf16.msra.mxu1 %v2194_v28 }
 0x421   :  { %1876 = vmatprep.subr.bf16.mxu1 %v1952_v53 }
 0x4d6   :  { %v628_v5 = vpop.f32.mrb[10].mxu1 }
 0x4d7   :  { %v629_v7 = vadd.f32 %v628_v5, %v2240_v47  ;;  %v1468_v8 = vpop.f32.mrb[11].mxu1 }
 0x4d9   :  { %1937 = vtanh.f32 %v629_v7 }
 0x4e3   :  { %v1938_v9 = vpop.eup %1937 }
 0x4e4   :  { %1502 = vmatmul.mubr.f32.vlgmr.msra.gmra.mrb[12].mxu0 %v1938_v9 }
 0x4e5   :  { %1854 = vmatpush3.bf16.msra.mxu0 %v2124_v1  ;;  %1571 = vmatprep.mubr.msk.f32.mxu0 %vm1954_vm8, %v1955_v29 }
 0x4e6   :  { %1855 = vmatprep.subr.bf16.mxu0 %v1952_v53 }
 0x4e9   :  { %1857 = vmatpush3.bf16.msra.mxu0 %v2133_v6 }
 0x4ea   :  { %1858 = vmatprep.subr.bf16.mxu0 %v1952_v53 }
 0x4ed   :  { %1860 = vmatpush3.bf16.msra.mxu0 %v2143_v11 }
 0x4ee   :  { %1861 = vmatprep.subr.bf16.mxu0 %v1952_v53 }
 0x4f1   :  { %1863 = vmatpush3.bf16.msra.mxu0 %v2153_v16 }
 0x4f2   :  { %1864 = vmatprep.subr.bf16.mxu0 %v1952_v53 }
 0x4f5   :  { %1866 = vmatpush3.bf16.msra.mxu0 %v2163_v19 }
 0x4f6   :  { %1867 = vmatprep.subr.bf16.mxu0 %v1952_v53 }
 0x4f9   :  { %1869 = vmatpush3.bf16.msra.mxu0 %v2173_v22 }
 0x4fa   :  { %1870 = vmatprep.subr.bf16.mxu0 %v1952_v53 }
 0x4fd   :  { %1872 = vmatpush3.bf16.msra.mxu0 %v2183_v25 }
 0x4fe   :  { %1873 = vmatprep.subr.bf16.mxu0 %v1952_v53 }
 0x501   :  { %1875 = vmatpush3.bf16.msra.mxu0 %v2194_v28 }
 0x502   :  { %1900 = vmatprep.subr.bf16.mxu0 %v1952_v53 }
 0x5b7   :  { %v699_v10 = vpop.f32.mrb[12].mxu0 }
 0x5b8   :  { %v700_v12 = vadd.f32 %v699_v10, %v2244_v54  ;;  %v1503_v13 = vpop.f32.mrb[13].mxu0 }
 0x5ba   :  { %1939 = vtanh.f32 %v700_v12 }
 0x5c4   :  { %v1940_v14 = vpop.eup %1939 }
 0x5c5   :  { %1537 = vmatmul.mubr.f32.vlgmr.msra.gmra.mrb[12].mxu1 %v1940_v14 }
 0x5c6   :  { %1878 = vmatpush3.bf16.msra.mxu1 %v2124_v1  ;;  %1606 = vmatprep.mubr.msk.f32.mxu1 %vm1954_vm8, %v1955_v29 }
 0x5c7   :  { %1879 = vmatprep.subr.bf16.mxu1 %v1952_v53 }
 0x5ca   :  { %1881 = vmatpush3.bf16.msra.mxu1 %v2133_v6 }
 0x5cb   :  { %1882 = vmatprep.subr.bf16.mxu1 %v1952_v53 }
 0x5ce   :  { %1884 = vmatpush3.bf16.msra.mxu1 %v2143_v11 }
 0x5cf   :  { %1885 = vmatprep.subr.bf16.mxu1 %v1952_v53 }
 0x5d2   :  { %1887 = vmatpush3.bf16.msra.mxu1 %v2153_v16  ;;  %v917_v16 = vld [vmem:[%s2412_s5] sm:$0xff] }
 0x5d3   :  { %1888 = vmatprep.subr.bf16.mxu1 %v1952_v53 }
 0x5d6   :  { %1890 = vmatpush3.bf16.msra.mxu1 %v2163_v19  ;;  %v1901_v19 = vpack.c.bf16 %v918_v17, %v917_v16 }
 0x5d7   :  { %1891 = vmatprep.subr.bf16.mxu1 %v1952_v53 }
 0x5da   :  { %1893 = vmatpush3.bf16.msra.mxu1 %v2173_v22  ;;  %v921_v22 = vld [vmem:[%s2412_s5 + $0x20] sm:$0xff] }
 0x5db   :  { %1894 = vmatprep.subr.bf16.mxu1 %v1952_v53  ;;  %v1907_v24 = vpack.c.bf16 %v922_v23, %v921_v22 }
 0x5de   :  { %1896 = vmatpush3.bf16.msra.mxu1 %v2183_v25  ;;  %v923_v25 = vld [vmem:[%s2412_s5 + $0x30] sm:$0xff] }
 0x5df   :  { %1897 = vmatprep.subr.bf16.mxu1 %v1952_v53  ;;  %v1910_v27 = vpack.c.bf16 %v924_v26, %v923_v25 }
 0x5e2   :  { %1899 = vmatpush3.bf16.msra.mxu1 %v2194_v28  ;;  %v925_v28 = vld [vmem:[%s2412_s5 + $0x40] sm:$0xff] }
 0x698   :  { %v770_v1 = vpop.f32.mrb[12].mxu1 }
 0x699   :  { %v771_v6 = vadd.f32 %v770_v1, %v2242_v51  ;;  %v1538_v11 = vpop.f32.mrb[13].mxu1 }
 0x69b   :  { %1941 = vtanh.f32 %v771_v6 }
 0x6a5   :  { %v1942_v15 = vpop.eup %1941 }
 0x6a6   :  { %1572 = vmatmul.mubr.f32.vlgmr.msra.gmra.mrb[14].mxu0 %v1942_v15 }
 0x6a7   :  { %1641 = vmatprep.mubr.msk.f32.mxu0 %vm1954_vm8, %v1955_v29  ;;  %1902 = vmatpush3.bf16.msra.mxu0 %v1901_v19  ;;  %v926_v29 = vld [vmem:[%s2412_s5 + $0x48] sm:$0xff] }
 0x6a8   :  { %1903 = vmatprep.subr.bf16.mxu0 %v1952_v53  ;;  %v1913_v30 = vpack.c.bf16 %v926_v29, %v925_v28 }
 0x6ab   :  { %1905 = vmatpush3.bf16.msra.mxu0 %v1904_v21 }
 0x6ac   :  { %1906 = vmatprep.subr.bf16.mxu0 %v1952_v53 }
 0x6af   :  { %1908 = vmatpush3.bf16.msra.mxu0 %v1907_v24 }
 0x6b0   :  { %1909 = vmatprep.subr.bf16.mxu0 %v1952_v53 }
 0x6b3   :  { %1911 = vmatpush3.bf16.msra.mxu0 %v1910_v27 }
 0x6b4   :  { %1912 = vmatprep.subr.bf16.mxu0 %v1952_v53 }
 0x6b7   :  { %1914 = vmatpush3.bf16.msra.mxu0 %v1913_v30 }
 0x6b8   :  { %1915 = vmatprep.subr.bf16.mxu0 %v1952_v53 }
 0x6bb   :  { %1917 = vmatpush3.bf16.msra.mxu0 %v1916_v37 }
 0x6bc   :  { %1918 = vmatprep.subr.bf16.mxu0 %v1952_v53 }
 0x6bf   :  { %1920 = vmatpush3.bf16.msra.mxu0 %v1919_v40 }
 0x6c0   :  { %1921 = vmatprep.subr.bf16.mxu0 %v1952_v53 }
 0x6c3   :  { %1923 = vmatpush3.bf16.msra.mxu0 %v1922_v43 }
 0x779   :  { %v841_v31 = vpop.f32.mrb[14].mxu0 }
 0x77a   :  { %v842_v32 = vadd.f32 %v841_v31, %v2248_v58  ;;  %v1573_v33 = vpop.f32.mrb[15].mxu0 }
 0x77c   :  { %1943 = vtanh.f32 %v842_v32 }
 0x786   :  { %v1944_v34 = vpop.eup %1943 }
 0x787   :  { %1607 = vmatmul.mubr.f32.vlgmr.msra.gmra.mrb[14].mxu1 %v1944_v34 }
 0x85a   :  { %v912_v44 = vpop.f32.mrb[14].mxu1 }
 0x85b   :  { %v913_v45 = vadd.f32 %v912_v44, %v2246_v56  ;;  %v1608_v46 = vpop.f32.mrb[15].mxu1 }
 0x85d   :  { %1945 = vtanh.f32 %v913_v45 }
 0x867   :  { %v1946_v47 = vpop.eup %1945 }
 0x868   :  { %1642 = vmatmul.mubr.f32.vlgmr.msra.gmra.mrb[16].mxu0 %v1946_v47 }
 0x93b   :  { %v1006_v49 = vpop.f32.mrb[16].mxu0 }
 0x93c   :  { %v1007_v50 = vadd.f32 %v1038_v48, %v1006_v49  ;;  %v1643_v51 = vpop.f32.mrb[17].mxu0 }
 0x93e   :  { %v1039_v52 = vmul.f32 -1.442695, %v1007_v50 }
 0x940   :  { %1947 = vpow2.f32 %v1039_v52 }
 0x94a   :  { %v1948_v54 = vpop.eup %1947 }
 0x94b   :  { %v1013_v55 = vadd.f32 1.0, %v1948_v54 }
 0x94d   :  { %1949 = vrcp.f32 %v1013_v55 }
 0x957   :  { %v1950_v53 = vpop.eup %1949 }
 0x958   :  { %1016 = vst [vmem:[%s2414_s7] sm:$0xff] %v1950_v53 }

</bundles_post_ra>
